<compile_context>
chip_gen: v7x
topology: tpu7x:2x2x1
jax: 0.10.0
libtpu: 0.0.40
codegen_flags: <defaults>
</compile_context>

<pallas_src>
import jax
import jax.numpy as jnp
from jax.experimental import pallas as pl
from jax.experimental.pallas import tpu as pltpu


# --------------------------------------------------------------------------
# helpers
# --------------------------------------------------------------------------
def _round_up(x: int, m: int) -> int:
    return (x + m - 1) // m * m


def _cdiv(a: int, b: int) -> int:
    return (a + b - 1) // b


def _sublane_multiple(dtype) -> int:
    # native sublane packing: 8 rows for 32-bit, 16 for bf16, 32 for 8-bit
    return 8 * 4 // jnp.dtype(dtype).itemsize


def _vmem_usable_bytes() -> int:
    """~3/4 of physical VMEM (96 MiB on v5e/v6e, 48 MiB on v7x)."""
    cap = None
    try:
        cap = int(getattr(pltpu.get_tpu_info(), "vmem_capacity_bytes", 0)) or None
    except Exception:
        cap = None
    if not cap:
        cap = 64 * 1024 * 1024  # conservative fallback (v7x per-core VMEM)
    return (cap * 3) // 4


# --------------------------------------------------------------------------
# one-time parameter prep (call at model load, NOT per forward pass)
# --------------------------------------------------------------------------
def prepare_feature_transformer(weight, bias, *, compute_dtype=jnp.bfloat16):
    """weight: [d_out, d_in] (PyTorch nn.Linear layout), bias: [d_out].

    Returns (w_t, b2d): weight transposed once to [d_in, d_out] in
    `compute_dtype` (bf16 default -> ~4x MXU rate on v6e/v7x and half the W
    DMA bytes; accumulation stays f32) and bias as a (1, d_out) f32 row.
    """
    d_out, d_in = weight.shape
    assert bias.shape == (d_out,)
    w_t = jnp.asarray(weight).T.astype(compute_dtype)            # [d_in, d_out]
    b2d = jnp.asarray(bias).reshape(1, d_out).astype(jnp.float32)
    return w_t, b2d


# --------------------------------------------------------------------------
# kernels
# --------------------------------------------------------------------------
def _ft_resident_kernel(x_ref, w_ref, b_ref, o_ref):
    # W ([d_in, d_out]) and bias are VMEM-resident (constant block index);
    # 1-D grid over row tiles.  In-kernel cast (e.g. f32 -> bf16) keeps x's
    # HBM traffic at 1x while feeding the MXU its fast dtype.
    x = x_ref[...].astype(w_ref.dtype)
    acc = jnp.dot(x, w_ref[...], preferred_element_type=jnp.float32)
    o_ref[...] = jnp.maximum(acc + b_ref[...], 0.0).astype(o_ref.dtype)


def _ft_tiled_kernel(x_ref, w_ref, b_ref, o_ref, acc_ref):
    # x_ref: (TN, TK), w_ref: (TK, TD), b_ref: (1, TD), o_ref: (TN, TD)
    # acc_ref: (TN, TD) f32 K-reduction accumulator.
    k = pl.program_id(2)

    @pl.when(k == 0)
    def _():
        acc_ref[...] = jnp.zeros_like(acc_ref)

    acc_ref[...] += jnp.dot(
        x_ref[...].astype(w_ref.dtype), w_ref[...],
        preferred_element_type=jnp.float32)

    @pl.when(k == pl.num_programs(2) - 1)
    def _():
        o_ref[...] = jnp.maximum(acc_ref[...] + b_ref[...], 0.0).astype(o_ref.dtype)


# --------------------------------------------------------------------------
# hot-path wrapper
# --------------------------------------------------------------------------
def feature_transformer(x, w_t, b2d, *, out_dtype=jnp.float32,
                        tile_n=None, tile_dout=None, tile_k=None,
                        force_tiled=False):
    """relu(x @ w_t + b2d), matching torch relu(nn.Linear(x)).

    x:   [N, D_IN]
    w_t: [D_IN, D_OUT]  (pre-transposed/pre-cast; see prepare_feature_transformer)
    b2d: [1, D_OUT] float32
    """
    n, d_in = x.shape
    d_in_w, d_out = w_t.shape
    assert d_in_w == d_in, "w_t must be [d_in, d_out] (pre-transposed)"
    assert b2d.shape == (1, d_out)

    compute_dtype = w_t.dtype
    xsize = jnp.dtype(x.dtype).itemsize
    csize = jnp.dtype(compute_dtype).itemsize
    osize = jnp.dtype(out_dtype).itemsize

    vmem_usable = _vmem_usable_bytes()
    sub = max(_sublane_multiple(x.dtype), _sublane_multiple(compute_dtype),
              _sublane_multiple(out_dtype))

    cost = pl.CostEstimate(
        flops=2 * n * d_in * d_out,
        transcendentals=0,
        bytes_accessed=(n * d_in * xsize + d_in * d_out * csize
                        + d_out * 4 + n * d_out * osize),
    )

    # ------------------ weight-resident fast path (1-D grid over N) --------
    # Budget conservatively assumes double-buffered blocks even for the
    # constant-index W / bias.
    w_res_bytes = 2 * d_in * d_out * csize + 2 * d_out * 4
    if not force_tiled:
        tn = 1024 if tile_n is None else tile_n
        tn = max(sub, _round_up(min(tn, _round_up(n, sub)), sub))

        def _fits_res(tn_):
            return (w_res_bytes + 2 * tn_ * d_in * xsize
                    + 2 * tn_ * d_out * osize) <= vmem_usable

        while tn > sub and not _fits_res(tn):
            tn = max(sub, _round_up(tn // 2, sub))

        if _fits_res(tn):
            # v7x megacore: give the single parallel axis >= 2 blocks when the
            # batch allows (no-op on single-TC v5e/v6e beyond one extra step).
            if _cdiv(n, tn) == 1 and n > sub:
                tn = max(sub, _round_up(_cdiv(n, 2), sub))

            vmem_est = (w_res_bytes + 2 * tn * d_in * xsize
                        + 2 * tn * d_out * osize)
            vmem_limit = int(min(vmem_usable, max(2 * vmem_est, 32 * 1024 * 1024)))

            return pl.pallas_call(
                _ft_resident_kernel,
                out_shape=jax.ShapeDtypeStruct((n, d_out), out_dtype),
                grid_spec=pltpu.PrefetchScalarGridSpec(
                    num_scalar_prefetch=0,
                    grid=(_cdiv(n, tn),),
                    in_specs=[
                        pl.BlockSpec((tn, d_in), lambda i: (i, 0)),     # x rows
                        pl.BlockSpec((d_in, d_out), lambda i: (0, 0)),  # W resident
                        pl.BlockSpec((1, d_out), lambda i: (0, 0)),     # b resident
                    ],
                    out_specs=pl.BlockSpec((tn, d_out), lambda i: (i, 0)),
                ),
                compiler_params=pltpu.CompilerParams(
                    dimension_semantics=("parallel",),
                    vmem_limit_bytes=vmem_limit,
                ),
                cost_estimate=cost,
            )(x, w_t, b2d)

    # ------------------ 3-D tiled fallback (W too large for VMEM) ----------
    d_in_p = _round_up(d_in, 128)
    d_out_p = _round_up(d_out, 128)

    # TODO(synk): in a real model pre-pad W/bias to 128-aligned shapes once at
    # load time instead of per call.
    wp = w_t if (d_in_p, d_out_p) == (d_in, d_out) else jnp.pad(
        w_t, ((0, d_in_p - d_in), (0, d_out_p - d_out)))
    bp = b2d if d_out_p == d_out else jnp.pad(b2d, ((0, 0), (0, d_out_p - d_out)))
    # Only the K axis of x needs padding (accumulator correctness); N stays
    # ragged -- Pallas masks the last row block on writeback.
    # TODO(synk): mask the K tail in-kernel instead of padding x when d_in%128!=0.
    xp = x if d_in_p == d_in else jnp.pad(x, ((0, 0), (0, d_in_p - d_in)))

    def _pick_tile(dim_p, requested, prefs):
        if requested is not None:
            assert requested % 128 == 0 and dim_p % requested == 0
            return requested
        for p in prefs:
            if p and dim_p % p == 0:
                return p
        return 128

    # v6e/v7x MXUs are 256-wide: prefer >=256-wide tiles; large tiles also
    # amortize the ~0.35 us per-grid-step overhead.
    td = _pick_tile(d_out_p, tile_dout, (512, 768, 384, 256, 128))
    tk = _pick_tile(d_in_p, tile_k,
                    (d_in_p if d_in_p <= 4096 else 0, 2048, 1024, 512, 256, 128))

    tn = 1024 if tile_n is None else tile_n
    tn = max(sub, _round_up(min(tn, _round_up(n, sub)), sub))

    def _fits_tiled(tn_, td_, tk_):
        return (2 * tn_ * tk_ * xsize         # x blocks
                + 2 * td_ * tk_ * csize       # w_t blocks [tk, td]
                + 2 * tn_ * td_ * osize       # out blocks
                + 2 * td_ * 4                 # bias block
                + tn_ * td_ * 4               # f32 accumulator scratch
                ) <= vmem_usable

    while (not _fits_tiled(tn, td, tk)) and tk > 256 and (tk // 2) % 128 == 0:
        tk //= 2
    while (not _fits_tiled(tn, td, tk)) and td > 256 and (td // 2) % 128 == 0:
        td //= 2
    while (not _fits_tiled(tn, td, tk)) and tn > sub:
        tn = max(sub, _round_up(tn // 2, sub))

    grid = (_cdiv(n, tn), d_out_p // td, d_in_p // tk)
    vmem_est = (2 * tn * tk * xsize + 2 * td * tk * csize + 2 * tn * td * osize
                + 2 * td * 4 + tn * td * 4)
    vmem_limit = int(min(vmem_usable, max(2 * vmem_est, 32 * 1024 * 1024)))

    out_p = pl.pallas_call(
        _ft_tiled_kernel,
        out_shape=jax.ShapeDtypeStruct((n, d_out_p), out_dtype),
        grid_spec=pltpu.PrefetchScalarGridSpec(
            num_scalar_prefetch=0,
            grid=grid,
            in_specs=[
                pl.BlockSpec((tn, tk), lambda i, j, k: (i, k)),   # x
                pl.BlockSpec((tk, td), lambda i, j, k: (k, j)),   # w_t
                # Bias block index is constant across the inner K loop, so it
                # is only re-DMA'd when j changes (a few hundred bytes).
                pl.BlockSpec((1, td), lambda i, j, k: (0, j)),
            ],
            out_specs=pl.BlockSpec((tn, td), lambda i, j, k: (i, j)),
            scratch_shapes=[pltpu.VMEM((tn, td), jnp.float32)],
        ),
        compiler_params=pltpu.CompilerParams(
            dimension_semantics=("parallel", "parallel", "arbitrary"),
            vmem_limit_bytes=vmem_limit,
        ),
        cost_estimate=cost,
    )(xp, wp, bp)

    return out_p if d_out_p == d_out else out_p[:, :d_out]


# --------------------------------------------------------------------------
# tests
# --------------------------------------------------------------------------
if __name__ == "__main__":
    key = jax.random.PRNGKey(0)

    # ---- Test 1: small shapes, f32 compute, weight-resident fast path -----
    N, D_IN, D_OUT = 8, 32, 16
    kx, kw, kb, key = jax.random.split(key, 4)
    bound = 1.0 / (D_IN ** 0.5)
    weight = jax.random.uniform(kw, (D_OUT, D_IN), jnp.float32, -bound, bound)
    bias = jax.random.uniform(kb, (D_OUT,), jnp.float32, -bound, bound)
    x = jax.random.normal(kx, (N, D_IN), jnp.float32)

    w_t, b2d = prepare_feature_transformer(weight, bias, compute_dtype=jnp.float32)
    out = jax.block_until_ready(feature_transformer(x, w_t, b2d))
    ref = jnp.maximum(x @ weight.T + bias, 0.0)
    assert out.shape == (N, D_OUT)
    assert jnp.allclose(out, ref, atol=1e-5, rtol=1e-5)

    # ---- Test 2: ragged N + unaligned dims, bf16 default, fast path -------
    N2, D_IN2, D_OUT2 = 50, 96, 40
    kx2, kw2, kb2, key = jax.random.split(key, 4)
    bound2 = 1.0 / (D_IN2 ** 0.5)
    weight2 = jax.random.uniform(kw2, (D_OUT2, D_IN2), jnp.float32, -bound2, bound2)
    bias2 = jax.random.uniform(kb2, (D_OUT2,), jnp.float32, -bound2, bound2)
    x2 = jax.random.normal(kx2, (N2, D_IN2), jnp.float32)

    w_t2, b2d2 = prepare_feature_transformer(weight2, bias2)   # bf16 default
    out2 = jax.block_until_ready(feature_transformer(x2, w_t2, b2d2))
    ref2 = jnp.maximum(x2 @ weight2.T + bias2, 0.0)
    assert out2.shape == (N2, D_OUT2)
    assert jnp.allclose(out2, ref2, atol=5e-2, rtol=5e-2)

    # ---- Test 3: forced 3-D tiled path (multi-step K accumulator), bf16 ---
    N3, D_IN3, D_OUT3 = 300, 256, 384
    kx3, kw3, kb3, key = jax.random.split(key, 4)
    bound3 = 1.0 / (D_IN3 ** 0.5)
    weight3 = jax.random.uniform(kw3, (D_OUT3, D_IN3), jnp.float32, -bound3, bound3)
    bias3 = jax.random.uniform(kb3, (D_OUT3,), jnp.float32, -bound3, bound3)
    x3 = jax.random.normal(kx3, (N3, D_IN3), jnp.float32)

    w_t3, b2d3 = prepare_feature_transformer(weight3, bias3)   # bf16 default
    out3 = jax.block_until_ready(feature_transformer(
        x3, w_t3, b2d3, force_tiled=True,
        tile_n=128, tile_dout=128, tile_k=128))                # grid = (3, 3, 2)
    ref3 = jnp.maximum(x3 @ weight3.T + bias3, 0.0)
    assert out3.shape == (N3, D_OUT3)
    assert jnp.allclose(out3, ref3, atol=5e-2, rtol=5e-2)

    print("KERNEL_OK")
</pallas_src>

<mosaic_0001>
module attributes {stable_mosaic.version = 11 : i64} {
  func.func @_ft_resident_kernel(%arg0: i32, %arg1: memref<8x32xf32, #tpu.memory_space<vmem>>, %arg2: memref<32x16xf32, #tpu.memory_space<vmem>>, %arg3: memref<1x16xf32, #tpu.memory_space<vmem>>, %arg4: memref<8x16xf32, #tpu.memory_space<vmem>>) attributes {dimension_semantics = [#tpu.dimension_semantics<parallel>], iteration_bounds = array<i64: 1>, scalar_prefetch = 0 : i64, scratch_operands = 0 : i64, tpu.core_type = #tpu.core_type<tc>, window_params = [{transform_indices = @transform_0, window_bounds = array<i64: 8, 32>}, {pipeline_mode = #tpu.pipeline_mode<synchronous>, transform_indices = @transform_1, window_bounds = array<i64: 32, 16>}, {pipeline_mode = #tpu.pipeline_mode<synchronous>, transform_indices = @transform_2, window_bounds = array<i64: 1, 16>}, {transform_indices = @transform_3, window_bounds = array<i64: 8, 16>}]} {
    %c0 = arith.constant 0 : index
    %c0_0 = arith.constant 0 : index
    %0 = vector.load %arg1[%c0, %c0_0] : memref<8x32xf32, #tpu.memory_space<vmem>>, vector<8x32xf32>
    %c0_1 = arith.constant 0 : index
    %c0_2 = arith.constant 0 : index
    %1 = vector.load %arg2[%c0_1, %c0_2] : memref<32x16xf32, #tpu.memory_space<vmem>>, vector<32x16xf32>
    %cst = arith.constant dense<0.000000e+00> : vector<8x16xf32>
    %2 = tpu.matmul %0, %1, %cst {dimension_numbers = #tpu.dot_dimension_numbers<[1], [0], [0], [1], [0, 0, 1, 1], [], []>} : vector<8x32xf32>, vector<32x16xf32>, vector<8x16xf32> -> vector<8x16xf32>
    %c0_3 = arith.constant 0 : index
    %c0_4 = arith.constant 0 : index
    %3 = vector.load %arg3[%c0_3, %c0_4] : memref<1x16xf32, #tpu.memory_space<vmem>>, vector<1x16xf32>
    %4 = vector.broadcast %3 : vector<1x16xf32> to vector<8x16xf32>
    %5 = arith.addf %2, %4 : vector<8x16xf32>
    %cst_5 = arith.constant 0.000000e+00 : f32
    %6 = vector.broadcast %cst_5 : f32 to vector<8x16xf32>
    %7 = arith.maximumf %5, %6 : vector<8x16xf32>
    %c0_6 = arith.constant 0 : index
    %c0_7 = arith.constant 0 : index
    %8 = vector.load %arg4[%c0_6, %c0_7] : memref<8x16xf32, #tpu.memory_space<vmem>>, vector<8x16xf32>
    tpu.vector_store %arg4[%c0_6, %c0_7], %7 {strides = array<i32>} : memref<8x16xf32, #tpu.memory_space<vmem>>, vector<8x16xf32>,
    return
  }
  func.func @transform_0(%arg0: i32) -> (i32, i32) {
    %c0_i32 = arith.constant 0 : i32
    %c0_i32_0 = arith.constant 0 : i32
    return %arg0, %c0_i32 : i32, i32
  }
  func.func @transform_1(%arg0: i32) -> (i32, i32) {
    %c0_i32 = arith.constant 0 : i32
    %c0_i32_0 = arith.constant 0 : i32
    %c0_i32_1 = arith.constant 0 : i32
    return %c0_i32, %c0_i32_0 : i32, i32
  }
  func.func @transform_2(%arg0: i32) -> (i32, i32) {
    %c0_i32 = arith.constant 0 : i32
    %c0_i32_0 = arith.constant 0 : i32
    %c0_i32_1 = arith.constant 0 : i32
    return %c0_i32, %c0_i32_0 : i32, i32
  }
  func.func @transform_3(%arg0: i32) -> (i32, i32) {
    %c0_i32 = arith.constant 0 : i32
    %c0_i32_0 = arith.constant 0 : i32
    return %arg0, %c0_i32 : i32, i32
  }
}

</mosaic_0001>

<bundles_post_ra>
// kernel: tpu_custom_call.1
= control target key start
LH: loop header
LB: loop body
LE: loop exit
PB: predicated region body
PF: predicated region fallthrough
CT: control target
= control target key end

     0   :  { %v170_v3 = vmov 0.0|0.0   ;;  %vm171_vm0 = vmmov 0   ;;  %v172_v6 = vmov 0.0   ;;  %s224_s0 = inlined_call_operand.vmem [shape: f32[8,32], index: 0, kind: input, shape index: {}]   ;;  %s225_s1 = inlined_call_operand.vmem [shape: f32[32,16], index: 1, kind: input, shape index: {}]   ;;  %s226_s2 = inlined_call_operand.vmem [shape: f32[1,16], index: 2, kind: input, shape index: {}]   ;;  %s227_s3 = inlined_call_operand.hbm [shape: f32[8,16], index: 3, kind: output, shape index: {}]  }
   0x1   :  { %v16_v0 = vld [vmem:[%s225_s1] sm:$0xff]  ;;  %v17_v1 = vld [vmem:[%s225_s1 + $0x8] sm:$0xff]  ;;  %v18_v2 = vld [vmem:[%s225_s1 + $0x10] sm:$0xff]  ;;  %136 = vmatprep.subr.bf16.mxu0 %v170_v3  ;;  %133 = vmatprep.mubr.msk.f32.mxu0 %vm171_vm0, %v172_v6 }
   0x2   :  { %v137_v4 = vpack.c.bf16 %v17_v1, %v16_v0  ;;  %v19_v5 = vld [vmem:[%s225_s1 + $0x18] sm:$0xff] }
   0x3   :  { %8 = vsyncpa [#allocation3], 0  ;;  %v140_v7 = vpack.c.bf16 %v19_v5, %v18_v2  ;;  %v15_v8 = vld [vmem:[%s224_s0] sm:$0xff]  ;;  %vm27_vm1 = vcmask 261120   ;;  %s173_s1 = smov [#allocation2]   ;;  %vm102_vm2 = vcmask 130048  }
   0x4   :  { %138 = vmatpush3.bf16.msra.mxu0 %v137_v4  ;;  %v118_v9 = vld [vmem:[%s226_s2] ss:$0 sm:$0xff]  ;;  %s110_s24 = sshll.u32 %s173_s1, 4  ;;  %s111_s24 = int_to_ptr.vmem [resolvable:$true] %s110_s24 }
   0x5   :  { %139 = vmatprep.subr.bf16.mxu0 %v170_v3  ;;  %s146_s25 = scalar_lea.vmem %s111_s24, 128  ;;  %p151_p1 = scmp.lt.s32.totalorder %s111_s24, %s111_s24 }
   0x6   :  { %p147_p0 = scmp.ne.s32.totalorder %s111_s24, %s146_s25  ;;  %p152_p2 = scmp.lt.s32.totalorder %s146_s25, %s146_s25 }
   0x8   :  { %141 = vmatpush3.bf16.msra.mxu0 %v140_v7  ;;  %p153_p3 = por %p152_p2, %p151_p1 }
   0xa   :  { %p154_p4 = pnand %p153_p3, %p147_p0 }
   0xb   :  { %134 = vmatmul.mubr.msk.f32.vlgmr.msra.gmra.mrb[0].mxu0 %vm27_vm1, %v15_v8 }
  0xde   :  { %v97_v10 = vpop.f32.mrb[0].mxu0 }
  0xdf   :  { %v98_v11 = vadd.f32 %v118_v9, %v97_v10  ;;  %v135_v12 = vpop.f32.mrb[1].mxu0 }
  0xe1   :  { %v101_v13 = vmax.f32 %v98_v11, 0.0 }
  0xe3   :  { %103 = vst.msk [vmem:[#allocation2] sm:$0xff] %vm102_vm2, %v101_v13 }
  0xe4   :  { %157 = shalt.err (!%p154_p4)
}
  0xe5   :  { %s158_s2 = scalar_lea.hbm %s227_s3, 128 }
  0xe6   :  { %p159_p5 = scmp.ne.s32.totalorder %s227_s3, %s158_s2  ;;  %p162_p6 = scmp.lt.u32.totalorder %s158_s2, %s227_s3 }
  0xe8   :  { %p164_p7 = pnand %p162_p6, %p159_p5 }
  0xea   :  { %167 = shalt.err (!%p164_p7)
}
  0xeb   :  { %113 = dma.vmem_to_hbm [thread:$0]  %s111_s24, 128, %s227_s3, [#allocation3]  }
  0xec   :  { %168 = dma.done.wait [#allocation3], 128  }
  0xed   :  { %169 = vsyncadd [#allocation3], 4294967168 }
  0xee   :  { %117 = vsyncpa [#allocation3], 1 }

</bundles_post_ra>
